<compile_context>
chip_gen: v7x
topology: tpu7x:2x2x1
jax: 0.10.0
libtpu: 0.0.40
codegen_flags: <defaults>
</compile_context>

<pallas_src>
import functools

import jax
import jax.numpy as jnp
from jax import lax
from jax.experimental import pallas as pl
from jax.experimental.pallas import tpu as pltpu


def _round_up(x: int, m: int) -> int:
    return (x + m - 1) // m * m


def _linear_kernel(x_ref, w_ref, b_ref, o_ref, acc_ref):
    """x_ref: (tm, tk) bf16, w_ref: (tn, tk) bf16, b_ref: (1, tn) f32,
    o_ref: (tm, tn) out dtype, acc_ref: (tm, tn) f32 scratch."""
    # Initialize the accumulator with the (broadcast) bias on the first K step.
    @pl.when(pl.program_id(2) == 0)
    def _():
        acc_ref[...] = jnp.broadcast_to(
            b_ref[...].astype(jnp.float32), acc_ref.shape)

    # (tm, tk) x (tn, tk) contracted on K -> (tm, tn); MXU consumes the RHS
    # directly, no separate transpose needed.
    acc_ref[...] += lax.dot_general(
        x_ref[...], w_ref[...],
        dimension_numbers=(((1,), (1,)), ((), ())),
        preferred_element_type=jnp.float32,
    )

    # Cast and store on the last K step.
    @pl.when(pl.program_id(2) == pl.num_programs(2) - 1)
    def _():
        o_ref[...] = acc_ref[...].astype(o_ref.dtype)


@functools.partial(jax.jit, static_argnames=("block_m", "block_n", "block_k"))
def row_parallel_linear(x, weight, bias, *, block_m=256, block_n=256, block_k=512):
    """Forward of RowParallelLinear (world_size=1):  Y = X @ W^T + b.

    x:      (..., in_features)
    weight: (out_features, in_features)   -- native PyTorch layout, no transpose
    bias:   (out_features,)
    """
    out_features, in_features = weight.shape
    lead_shape = x.shape[:-1]
    m = 1
    for d in lead_shape:
        m *= d

    out_dtype = x.dtype
    mxu_dtype = jnp.bfloat16

    # Pad to hardware-friendly sizes: M -> mult of 8 (sublane),
    # N, K -> mult of 128 (lane-dense); then make them divisible by the tiles.
    m_pad = _round_up(max(m, 1), 8)
    n_pad = _round_up(out_features, 128)
    k_pad = _round_up(in_features, 128)

    tm = min(block_m, m_pad)
    tn = min(block_n, n_pad)
    tk = min(block_k, k_pad)

    m_pad = _round_up(m_pad, tm)
    n_pad = _round_up(n_pad, tn)
    k_pad = _round_up(k_pad, tk)

    x2d = x.reshape(m, in_features).astype(mxu_dtype)
    w = weight.astype(mxu_dtype)
    b = bias.astype(jnp.float32)

    x2d = jnp.pad(x2d, ((0, m_pad - m), (0, k_pad - in_features)))
    w = jnp.pad(w, ((0, n_pad - out_features), (0, k_pad - in_features)))
    b2d = jnp.pad(b, (0, n_pad - out_features)).reshape(1, n_pad)

    grid = (m_pad // tm, n_pad // tn, k_pad // tk)

    out2d = pl.pallas_call(
        _linear_kernel,
        out_shape=jax.ShapeDtypeStruct((m_pad, n_pad), out_dtype),
        grid_spec=pltpu.PrefetchScalarGridSpec(
            num_scalar_prefetch=0,
            grid=grid,
            in_specs=[
                pl.BlockSpec((tm, tk), lambda i, j, k: (i, k)),   # X tile
                pl.BlockSpec((tn, tk), lambda i, j, k: (j, k)),   # W tile (N,K)
                pl.BlockSpec((1, tn), lambda i, j, k: (0, j)),    # bias tile
            ],
            out_specs=pl.BlockSpec((tm, tn), lambda i, j, k: (i, j)),
            scratch_shapes=[pltpu.VMEM((tm, tn), jnp.float32)],
        ),
        compiler_params=pltpu.CompilerParams(
            dimension_semantics=("parallel", "parallel", "arbitrary"),
            vmem_limit_bytes=48 * 1024 * 1024,
        ),
    )(x2d, w, b2d)

    out2d = out2d[:m, :out_features]
    return out2d.reshape(*lead_shape, out_features)


def init_params(key, in_features, out_features, dtype=jnp.float32):
    # xavier_normal_: std = sqrt(2 / (fan_in + fan_out)); bias zero-init.
    std = (2.0 / (in_features + out_features)) ** 0.5
    weight = std * jax.random.normal(key, (out_features, in_features), dtype=dtype)
    bias = jnp.zeros((out_features,), dtype=dtype)
    return weight, bias


if __name__ == "__main__":
    # Small but non-trivial shapes: exercises K tiling (K=1024 > tk=512),
    # N tiling + N padding (384 -> 512), and ragged M padding (10 -> 16).
    in_features = 1024
    out_features = 384
    batch, seq = 2, 5

    key = jax.random.PRNGKey(0)
    k_w, k_x = jax.random.split(key)

    weight, bias = init_params(k_w, in_features, out_features)
    x = jax.random.normal(k_x, (batch, seq, in_features), dtype=jnp.float32)

    out = row_parallel_linear(x, weight, bias)
    out = jax.block_until_ready(out)

    # Reference (pure JAX, f32): Y = X @ W^T + b.  Tolerance loosened for the
    # bf16 MXU feed (f32 accumulation).
    ref = x @ weight.T + bias
    assert out.shape == (batch, seq, out_features)
    assert jnp.allclose(out, ref, atol=2e-2, rtol=2e-2), (
        float(jnp.max(jnp.abs(out - ref))))

    print("KERNEL_OK")
</pallas_src>

<mosaic_0001>
module attributes {stable_mosaic.version = 11 : i64} {
  func.func @_linear_kernel(%arg0: i32, %arg1: i32, %arg2: i32, %arg3: memref<16x512xbf16, #tpu.memory_space<vmem>>, %arg4: memref<256x512xbf16, #tpu.memory_space<vmem>>, %arg5: memref<1x256xf32, #tpu.memory_space<vmem>>, %arg6: memref<16x256xf32, #tpu.memory_space<vmem>>, %arg7: memref<16x256xf32, #tpu.memory_space<vmem>>) attributes {dimension_semantics = [#tpu.dimension_semantics<parallel>, #tpu.dimension_semantics<parallel>, #tpu.dimension_semantics<arbitrary>], iteration_bounds = array<i64: 1, 2, 2>, scalar_prefetch = 0 : i64, scratch_operands = 1 : i64, tpu.core_type = #tpu.core_type<tc>, window_params = [{transform_indices = @transform_0, window_bounds = array<i64: 16, 512>}, {transform_indices = @transform_1, window_bounds = array<i64: 256, 512>}, {transform_indices = @transform_2, window_bounds = array<i64: 1, 256>}, {transform_indices = @transform_3, window_bounds = array<i64: 16, 256>}]} {
    %c0_i32 = arith.constant 0 : i32
    %0 = arith.cmpi eq, %arg2, %c0_i32 : i32
    %1 = arith.extui %0 : i1 to i32
    %c0_i32_0 = arith.constant 0 : i32
    %2 = arith.cmpi ne, %1, %c0_i32_0 : i32
    scf.if %2 {
      %c0_9 = arith.constant 0 : index
      %c0_10 = arith.constant 0 : index
      %12 = vector.load %arg5[%c0_9, %c0_10] : memref<1x256xf32, #tpu.memory_space<vmem>>, vector<1x256xf32>
      %13 = vector.shape_cast %12 : vector<1x256xf32> to vector<1x256xf32>
      %14 = vector.broadcast %13 : vector<1x256xf32> to vector<16x256xf32>
      %c0_11 = arith.constant 0 : index
      %c0_12 = arith.constant 0 : index
      %15 = vector.load %arg7[%c0_11, %c0_12] : memref<16x256xf32, #tpu.memory_space<vmem>>, vector<16x256xf32>
      tpu.vector_store %arg7[%c0_11, %c0_12], %14 {strides = array<i32>} : memref<16x256xf32, #tpu.memory_space<vmem>>, vector<16x256xf32>,
    } else {
    }
    %c0 = arith.constant 0 : index
    %c0_1 = arith.constant 0 : index
    %3 = vector.load %arg7[%c0, %c0_1] : memref<16x256xf32, #tpu.memory_space<vmem>>, vector<16x256xf32>
    %c0_2 = arith.constant 0 : index
    %c0_3 = arith.constant 0 : index
    %4 = vector.load %arg3[%c0_2, %c0_3] : memref<16x512xbf16, #tpu.memory_space<vmem>>, vector<16x512xbf16>
    %c0_4 = arith.constant 0 : index
    %c0_5 = arith.constant 0 : index
    %5 = vector.load %arg4[%c0_4, %c0_5] : memref<256x512xbf16, #tpu.memory_space<vmem>>, vector<256x512xbf16>
    %cst = arith.constant dense<0.000000e+00> : vector<16x256xf32>
    %6 = tpu.matmul %4, %5, %cst {dimension_numbers = #tpu.dot_dimension_numbers<[1], [1], [0], [0], [0, 0, 1, 0], [], []>} : vector<16x512xbf16>, vector<256x512xbf16>, vector<16x256xf32> -> vector<16x256xf32>
    %7 = arith.addf %3, %6 : vector<16x256xf32>
    %c0_6 = arith.constant 0 : index
    %c0_7 = arith.constant 0 : index
    %8 = vector.load %arg7[%c0_6, %c0_7] : memref<16x256xf32, #tpu.memory_space<vmem>>, vector<16x256xf32>
    tpu.vector_store %arg7[%c0_6, %c0_7], %7 {strides = array<i32>} : memref<16x256xf32, #tpu.memory_space<vmem>>, vector<16x256xf32>,
    %c1_i32 = arith.constant 1 : i32
    %9 = arith.cmpi eq, %arg2, %c1_i32 : i32
    %10 = arith.extui %9 : i1 to i32
    %c0_i32_8 = arith.constant 0 : i32
    %11 = arith.cmpi ne, %10, %c0_i32_8 : i32
    scf.if %11 {
      %c0_9 = arith.constant 0 : index
      %c0_10 = arith.constant 0 : index
      %12 = vector.load %arg7[%c0_9, %c0_10] : memref<16x256xf32, #tpu.memory_space<vmem>>, vector<16x256xf32>
      %c0_11 = arith.constant 0 : index
      %c0_12 = arith.constant 0 : index
      %13 = vector.load %arg6[%c0_11, %c0_12] : memref<16x256xf32, #tpu.memory_space<vmem>>, vector<16x256xf32>
      tpu.vector_store %arg6[%c0_11, %c0_12], %12 {strides = array<i32>} : memref<16x256xf32, #tpu.memory_space<vmem>>, vector<16x256xf32>,
    } else {
    }
    return
  }
  func.func @transform_0(%arg0: i32, %arg1: i32, %arg2: i32) -> (i32, i32) {
    %c0_i32 = arith.constant 0 : i32
    return %arg0, %arg2 : i32, i32
  }
  func.func @transform_1(%arg0: i32, %arg1: i32, %arg2: i32) -> (i32, i32) {
    %c0_i32 = arith.constant 0 : i32
    return %arg1, %arg2 : i32, i32
  }
  func.func @transform_2(%arg0: i32, %arg1: i32, %arg2: i32) -> (i32, i32) {
    %c0_i32 = arith.constant 0 : i32
    %c0_i32_0 = arith.constant 0 : i32
    return %c0_i32, %arg1 : i32, i32
  }
  func.func @transform_3(%arg0: i32, %arg1: i32, %arg2: i32) -> (i32, i32) {
    %c0_i32 = arith.constant 0 : i32
    return %arg0, %arg1 : i32, i32
  }
}

</mosaic_0001>

<bundles_post_ra>
// kernel: row_parallel_linear.1
= control target key start
LH: loop header
LB: loop body
LE: loop exit
PB: predicated region body
PF: predicated region fallthrough
CT: control target
= control target key end

     0   :  { %s1869_s0 = inlined_call_operand.vmem [shape: bf16[16,1024], index: 0, kind: input, shape index: {}]   ;;  %s1870_s1 = inlined_call_operand.vmem [shape: bf16[512,1024], index: 1, kind: input, shape index: {}]   ;;  %s1871_s2 = inlined_call_operand.vmem [shape: f32[1,512], index: 2, kind: input, shape index: {}]   ;;  %s1872_s3 = inlined_call_operand.vmem [shape: f32[16,512], index: 3, kind: output, shape index: {}]  }
   0x1   :  { %1874 = sst [smem:[#allocation7_spill]] %s1869_s0 }
   0x2   :  { %1875 = sst [smem:[#allocation8_spill]] %s1870_s1 }
   0x3   :  { %s1491_s12 = smov 0   ;;  %s1493_s13 = smov 0  }
   0x4   :  { %s1495_s14 = smov 0   ;;  %s1497_s15 = smov 0  }
   0x5   :  { %s1499_s16 = smov 0   ;;  %s1501_s17 = smov 0  }
   0x6   :  { %s1503_s18 = smov 0   ;;  %s1505_s19 = smov 0  }
   0x7   :  { %s1507_s20 = smov 0   ;;  %s1509_s21 = smov 0  }
   0x8   :  { %s1511_s22 = smov 0  }
   0x9 LB: > { %s1094_s23 = sadd.s32 4294967295, %s1469_s22   ;;  %s25_s24 = sadd.s32 1, %s1461_s20  ;;  %s1469_s22 = sphi %s1511_s22, %s13_s22   ;;  %s1465_s21 = sphi %s1509_s21, %s1892_s21   ;;  %s1461_s20 = sphi %s1507_s20, %s1891_s20   ;;  %s1457_s19 = sphi %s1505_s19, %s1890_s19   ;;  %s1453_s18 = sphi %s1503_s18, %s1889_s18   ;;  %s1449_s17 = sphi %s1501_s17, %s1888_s17   ;;  %s1445_s16 = sphi %s1499_s16, %s1887_s16   ;;  %s1441_s15 = sphi %s1497_s15, %s1886_s15   ;;  %s1437_s14 = sphi %s1495_s14, %s1885_s14   ;;  %s1433_s13 = sphi %s1493_s13, %s1884_s13   ;;  %s1429_s12 = sphi %s1491_s12, %s1883_s12  }
   0xa   : > { %p26_p0 = scmp.ge.s32.totalorder %s25_s24, 2  ;;  %s28_s25 = sadd.s32 1, %s1465_s21 }
   0xb   : > { %s41_s26 = sadd.s32 1, %s1449_s17  ;;  %p48_p1 = scmp.ne.s32.totalorder %s1449_s17, %s1445_s16 }
   0xc   : > { %s1894_s24 = smov (%p26_p0, %s25_s24), 0  ;;  %s1896_s25 = smov (!%p26_p0, %s28_s25), %s1465_s21 }
   0xd   : > { %s37_s27 = ssub.s32 %s1461_s20, %s1894_s24  ;;  %p49_p2 = scmp.eq.s32.totalorder %s1469_s22, 0 }
   0xe   : > { %p30_p3 = scmp.ge.s32.totalorder %s1896_s25, 2  ;;  %p39_p4 = scmp.eq.s32.totalorder %s37_s27, 0 }
   0xf   : > { %p1558_p5 = por %p49_p2, %p48_p1  ;;  %s69_s29 = sadd.s32 1, %s1441_s15 }
  0x10   : > { %s1898_s25 = smov (%p30_p3, %s1896_s25), 0  ;;  %p76_p6 = scmp.ne.s32.totalorder %s1441_s15, %s1437_s14 }
  0x11   : > { %1877 = sst [smem:[#allocation6_spill]] %s1898_s25  ;;  %s64_s4 = ssub.s32 %s1465_s21, %s1898_s25 }
  0x12   : > { %s1566_s30 = scalar_select %p39_p4, %s1449_s17, %s41_s26  }
  0x13   : > { %s66_s5 = sor.u32 %s64_s4, %s37_s27  ;;  %p121_p7 = scmp.eq.s32.totalorder %s64_s4, 0 }
  0x14   : > { %p67_p8 = scmp.eq.s32.totalorder %s66_s5, 0  ;;  %p1572_p9 = por %p76_p6, %p49_p2 }
  0x15   : > { %s123_s7 = sadd.s32 1, %s1433_s13  ;;  %p133_p10 = scmp.ne.s32.totalorder %s1433_s13, %s1429_s12 }
  0x16   : > { %s1580_s8 = scalar_select %p67_p8, %s1441_s15, %s69_s29  }
  0x17   : > { %s1583_s9 = scalar_select %p121_p7, %s1433_s13, %s123_s7  }
  0x18   : > { %p134_p11 = scmp.eq.s32.totalorder %s1094_s23, 3  ;;  %p1097_p13 = scmp.ge.s32.totalorder %s1469_s22, 4 }
  0x1a   : > { %p1585_p12 = por %p134_p11, %p133_p10  ;;  %156 = sbr.rel (%p1097_p13) target bundleno = 87 (0x57), region = 16 }
  0x21   : > { %159 = sbr.rel (!%p1558_p5) target bundleno = 45 (0x2d), region = 20  ;;  %s161_s11 = sand.u32 (%p1558_p5), 1, %s1449_s17  }
  0x22   : > { %s1186_s26 = sshll.u32 (%p1558_p5), %s1461_s20, 4  ;;  %s1098_s27 = sshll.u32 (%p1558_p5), %s161_s11, 5 }
  0x23   : > { %s1880_s0 = sld [smem:[#allocation7_spill]] (%p1558_p5)  ;;  %s163_s23 = scalar_lea.vmem (%p1558_p5), [#allocation3], %s1098_s27 }
  0x29   : > { %s169_s5 = scalar_lea.vmem %s1880_s0, %s1186_s26 }
  0x2a   : > { %v182_v0 = vld [vmem:[%s169_s5] sm:$0xff]  ;;  %v184_v1 = vld [vmem:[%s169_s5 + $0x8] sm:$0xff] }
  0x2b   : > { %v186_v2 = vld [vmem:[%s169_s5 + $0x20] sm:$0xff]  ;;  %183 = vst [vmem:[%s163_s23] sm:$0xff] %v182_v0  ;;  %185 = vst [vmem:[%s163_s23 + $0x8] sm:$0xff] %v184_v1  ;;  %v188_v3 = vld [vmem:[%s169_s5 + $0x28] sm:$0xff] }
  0x2c   : > { %187 = vst [vmem:[%s163_s23 + $0x10] sm:$0xff] %v186_v2  ;;  %189 = vst [vmem:[%s163_s23 + $0x18] sm:$0xff] %v188_v3 }
  0x2d PF: > { %195 = sbr.rel (!%p1572_p9) target bundleno = 87 (0x57), region = 43  ;;  %s197_s28 = sand.u32 (%p1572_p9), 1, %s1441_s15  }
  0x2e   : > { %s1103_s7 = sshll.u32 (%p1572_p9), %s1461_s20, 2  ;;  %s1101_s11 = sshll.u32 (%p1572_p9), %s197_s28, 9 }
  0x2f   : > { %s1187_s26 = sshll.u32 (%p1572_p9), %s1465_s21, 8  ;;  %s1881_s1 = sld [smem:[#allocation8_spill]] (%p1572_p9) }
  0x30   : > { %s203_s29 = sadd.s32 (%p1572_p9), %s1187_s26, %s1103_s7  ;;  %s1610_s6 = scalar_lea.vmem (%p1572_p9), [#allocation4], %s1101_s11 }
  0x31   : > { %s1105_s4 = sshll.u32 (%p1572_p9), %s203_s29, 2 }
  0x35   : > { %s1605_s25 = scalar_lea.vmem %s1881_s1, %s1105_s4 }
  0x36   : > { %v218_v4 = vld [vmem:[%s1605_s25] sm:$0xff]  ;;  %v220_v5 = vld [vmem:[%s1605_s25 + $0x8] sm:$0xff] }
  0x37   : > { %v222_v6 = vld [vmem:[%s1605_s25 + $0x20] sm:$0xff]  ;;  %219 = vst [vmem:[%s1610_s6] sm:$0xff] %v218_v4  ;;  %221 = vst [vmem:[%s1610_s6 + $0x8] sm:$0xff] %v220_v5  ;;  %v224_v7 = vld [vmem:[%s1605_s25 + $0x28] sm:$0xff] }
  0x38   : > { %223 = vst [vmem:[%s1610_s6 + $0x10] sm:$0xff] %v222_v6  ;;  %v226_v8 = vld [vmem:[%s1605_s25 + $0x40] sm:$0xff]  ;;  %v228_v9 = vld [vmem:[%s1605_s25 + $0x48] sm:$0xff]  ;;  %225 = vst [vmem:[%s1610_s6 + $0x18] sm:$0xff] %v224_v7 }
  0x39   : > { %227 = vst [vmem:[%s1610_s6 + $0x20] sm:$0xff] %v226_v8  ;;  %229 = vst [vmem:[%s1610_s6 + $0x28] sm:$0xff] %v228_v9  ;;  %v230_v10 = vld [vmem:[%s1605_s25 + $0x60] sm:$0xff]  ;;  %v232_v11 = vld [vmem:[%s1605_s25 + $0x68] sm:$0xff] }
  0x3a   : > { %v234_v12 = vld [vmem:[%s1605_s25 + $0x80] sm:$0xff]  ;;  %231 = vst [vmem:[%s1610_s6 + $0x30] sm:$0xff] %v230_v10  ;;  %233 = vst [vmem:[%s1610_s6 + $0x38] sm:$0xff] %v232_v11  ;;  %v236_v13 = vld [vmem:[%s1605_s25 + $0x88] sm:$0xff] }
  0x3b   : > { %235 = vst [vmem:[%s1610_s6 + $0x40] sm:$0xff] %v234_v12  ;;  %v238_v14 = vld [vmem:[%s1605_s25 + $0xa0] sm:$0xff]  ;;  %v240_v15 = vld [vmem:[%s1605_s25 + $0xa8] sm:$0xff]  ;;  %237 = vst [vmem:[%s1610_s6 + $0x48] sm:$0xff] %v236_v13 }
  0x3c   : > { %239 = vst [vmem:[%s1610_s6 + $0x50] sm:$0xff] %v238_v14  ;;  %241 = vst [vmem:[%s1610_s6 + $0x58] sm:$0xff] %v240_v15  ;;  %v242_v16 = vld [vmem:[%s1605_s25 + $0xc0] sm:$0xff]  ;;  %v244_v17 = vld [vmem:[%s1605_s25 + $0xc8] sm:$0xff] }
  0x3d   : > { %v246_v18 = vld [vmem:[%s1605_s25 + $0xe0] sm:$0xff]  ;;  %243 = vst [vmem:[%s1610_s6 + $0x60] sm:$0xff] %v242_v16  ;;  %245 = vst [vmem:[%s1610_s6 + $0x68] sm:$0xff] %v244_v17  ;;  %v248_v19 = vld [vmem:[%s1605_s25 + $0xe8] sm:$0xff] }
  0x3e   : > { %247 = vst [vmem:[%s1610_s6 + $0x70] sm:$0xff] %v246_v18  ;;  %v250_v20 = vld [vmem:[%s1605_s25 + $0x100] sm:$0xff]  ;;  %v252_v21 = vld [vmem:[%s1605_s25 + $0x108] sm:$0xff]  ;;  %249 = vst [vmem:[%s1610_s6 + $0x78] sm:$0xff] %v248_v19 }
  0x3f   : > { %251 = vst [vmem:[%s1610_s6 + $0x80] sm:$0xff] %v250_v20  ;;  %253 = vst [vmem:[%s1610_s6 + $0x88] sm:$0xff] %v252_v21  ;;  %v254_v22 = vld [vmem:[%s1605_s25 + $0x120] sm:$0xff]  ;;  %v256_v23 = vld [vmem:[%s1605_s25 + $0x128] sm:$0xff] }
  0x40   : > { %v258_v24 = vld [vmem:[%s1605_s25 + $0x140] sm:$0xff]  ;;  %255 = vst [vmem:[%s1610_s6 + $0x90] sm:$0xff] %v254_v22  ;;  %257 = vst [vmem:[%s1610_s6 + $0x98] sm:$0xff] %v256_v23  ;;  %v260_v25 = vld [vmem:[%s1605_s25 + $0x148] sm:$0xff] }
  0x41   : > { %259 = vst [vmem:[%s1610_s6 + $0xa0] sm:$0xff] %v258_v24  ;;  %v262_v26 = vld [vmem:[%s1605_s25 + $0x160] sm:$0xff]  ;;  %v264_v27 = vld [vmem:[%s1605_s25 + $0x168] sm:$0xff]  ;;  %261 = vst [vmem:[%s1610_s6 + $0xa8] sm:$0xff] %v260_v25 }
  0x42   : > { %263 = vst [vmem:[%s1610_s6 + $0xb0] sm:$0xff] %v262_v26  ;;  %265 = vst [vmem:[%s1610_s6 + $0xb8] sm:$0xff] %v264_v27  ;;  %v266_v28 = vld [vmem:[%s1605_s25 + $0x180] sm:$0xff]  ;;  %v268_v29 = vld [vmem:[%s1605_s25 + $0x188] sm:$0xff] }
  0x43   : > { %v270_v30 = vld [vmem:[%s1605_s25 + $0x1a0] sm:$0xff]  ;;  %267 = vst [vmem:[%s1610_s6 + $0xc0] sm:$0xff] %v266_v28  ;;  %269 = vst [vmem:[%s1610_s6 + $0xc8] sm:$0xff] %v268_v29  ;;  %v272_v31 = vld [vmem:[%s1605_s25 + $0x1a8] sm:$0xff] }
  0x44   : > { %271 = vst [vmem:[%s1610_s6 + $0xd0] sm:$0xff] %v270_v30  ;;  %v274_v32 = vld [vmem:[%s1605_s25 + $0x1c0] sm:$0xff]  ;;  %v276_v33 = vld [vmem:[%s1605_s25 + $0x1c8] sm:$0xff]  ;;  %273 = vst [vmem:[%s1610_s6 + $0xd8] sm:$0xff] %v272_v31 }
  0x45   : > { %275 = vst [vmem:[%s1610_s6 + $0xe0] sm:$0xff] %v274_v32  ;;  %277 = vst [vmem:[%s1610_s6 + $0xe8] sm:$0xff] %v276_v33  ;;  %v278_v34 = vld [vmem:[%s1605_s25 + $0x1e0] sm:$0xff]  ;;  %v280_v35 = vld [vmem:[%s1605_s25 + $0x1e8] sm:$0xff] }
  0x46   : > { %v282_v36 = vld [vmem:[%s1605_s25 + $0x200] sm:$0xff]  ;;  %279 = vst [vmem:[%s1610_s6 + $0xf0] sm:$0xff] %v278_v34  ;;  %281 = vst [vmem:[%s1610_s6 + $0xf8] sm:$0xff] %v280_v35  ;;  %v284_v37 = vld [vmem:[%s1605_s25 + $0x208] sm:$0xff] }
  0x47   : > { %283 = vst [vmem:[%s1610_s6 + $0x100] sm:$0xff] %v282_v36  ;;  %v286_v38 = vld [vmem:[%s1605_s25 + $0x220] sm:$0xff]  ;;  %v288_v39 = vld [vmem:[%s1605_s25 + $0x228] sm:$0xff]  ;;  %285 = vst [vmem:[%s1610_s6 + $0x108] sm:$0xff] %v284_v37 }
  0x48   : > { %287 = vst [vmem:[%s1610_s6 + $0x110] sm:$0xff] %v286_v38  ;;  %289 = vst [vmem:[%s1610_s6 + $0x118] sm:$0xff] %v288_v39  ;;  %v290_v40 = vld [vmem:[%s1605_s25 + $0x240] sm:$0xff]  ;;  %v292_v41 = vld [vmem:[%s1605_s25 + $0x248] sm:$0xff] }
  0x49   : > { %v294_v42 = vld [vmem:[%s1605_s25 + $0x260] sm:$0xff]  ;;  %291 = vst [vmem:[%s1610_s6 + $0x120] sm:$0xff] %v290_v40  ;;  %293 = vst [vmem:[%s1610_s6 + $0x128] sm:$0xff] %v292_v41  ;;  %v296_v43 = vld [vmem:[%s1605_s25 + $0x268] sm:$0xff] }
  0x4a   : > { %295 = vst [vmem:[%s1610_s6 + $0x130] sm:$0xff] %v294_v42  ;;  %v298_v44 = vld [vmem:[%s1605_s25 + $0x280] sm:$0xff]  ;;  %v300_v45 = vld [vmem:[%s1605_s25 + $0x288] sm:$0xff]  ;;  %297 = vst [vmem:[%s1610_s6 + $0x138] sm:$0xff] %v296_v43 }
  0x4b   : > { %299 = vst [vmem:[%s1610_s6 + $0x140] sm:$0xff] %v298_v44  ;;  %301 = vst [vmem:[%s1610_s6 + $0x148] sm:$0xff] %v300_v45  ;;  %v302_v46 = vld [vmem:[%s1605_s25 + $0x2a0] sm:$0xff]  ;;  %v304_v47 = vld [vmem:[%s1605_s25 + $0x2a8] sm:$0xff] }
  0x4c   : > { %v306_v48 = vld [vmem:[%s1605_s25 + $0x2c0] sm:$0xff]  ;;  %303 = vst [vmem:[%s1610_s6 + $0x150] sm:$0xff] %v302_v46  ;;  %305 = vst [vmem:[%s1610_s6 + $0x158] sm:$0xff] %v304_v47  ;;  %v308_v49 = vld [vmem:[%s1605_s25 + $0x2c8] sm:$0xff] }
  0x4d   : > { %307 = vst [vmem:[%s1610_s6 + $0x160] sm:$0xff] %v306_v48  ;;  %v310_v50 = vld [vmem:[%s1605_s25 + $0x2e0] sm:$0xff]  ;;  %v312_v51 = vld [vmem:[%s1605_s25 + $0x2e8] sm:$0xff]  ;;  %309 = vst [vmem:[%s1610_s6 + $0x168] sm:$0xff] %v308_v49 }
  0x4e   : > { %311 = vst [vmem:[%s1610_s6 + $0x170] sm:$0xff] %v310_v50  ;;  %313 = vst [vmem:[%s1610_s6 + $0x178] sm:$0xff] %v312_v51  ;;  %v314_v52 = vld [vmem:[%s1605_s25 + $0x300] sm:$0xff]  ;;  %v316_v53 = vld [vmem:[%s1605_s25 + $0x308] sm:$0xff] }
  0x4f   : > { %v318_v54 = vld [vmem:[%s1605_s25 + $0x320] sm:$0xff]  ;;  %315 = vst [vmem:[%s1610_s6 + $0x180] sm:$0xff] %v314_v52  ;;  %317 = vst [vmem:[%s1610_s6 + $0x188] sm:$0xff] %v316_v53  ;;  %v320_v55 = vld [vmem:[%s1605_s25 + $0x328] sm:$0xff] }
  0x50   : > { %319 = vst [vmem:[%s1610_s6 + $0x190] sm:$0xff] %v318_v54  ;;  %v322_v56 = vld [vmem:[%s1605_s25 + $0x340] sm:$0xff]  ;;  %v324_v57 = vld [vmem:[%s1605_s25 + $0x348] sm:$0xff]  ;;  %321 = vst [vmem:[%s1610_s6 + $0x198] sm:$0xff] %v320_v55 }
  0x51   : > { %323 = vst [vmem:[%s1610_s6 + $0x1a0] sm:$0xff] %v322_v56  ;;  %325 = vst [vmem:[%s1610_s6 + $0x1a8] sm:$0xff] %v324_v57  ;;  %v326_v58 = vld [vmem:[%s1605_s25 + $0x360] sm:$0xff]  ;;  %v328_v59 = vld [vmem:[%s1605_s25 + $0x368] sm:$0xff] }
  0x52   : > { %v330_v60 = vld [vmem:[%s1605_s25 + $0x380] sm:$0xff]  ;;  %327 = vst [vmem:[%s1610_s6 + $0x1b0] sm:$0xff] %v326_v58  ;;  %329 = vst [vmem:[%s1610_s6 + $0x1b8] sm:$0xff] %v328_v59  ;;  %v332_v61 = vld [vmem:[%s1605_s25 + $0x388] sm:$0xff] }
  0x53   : > { %331 = vst [vmem:[%s1610_s6 + $0x1c0] sm:$0xff] %v330_v60  ;;  %v334_v62 = vld [vmem:[%s1605_s25 + $0x3a0] sm:$0xff]  ;;  %v336_v63 = vld [vmem:[%s1605_s25 + $0x3a8] sm:$0xff]  ;;  %333 = vst [vmem:[%s1610_s6 + $0x1c8] sm:$0xff] %v332_v61 }
  0x54   : > { %335 = vst [vmem:[%s1610_s6 + $0x1d0] sm:$0xff] %v334_v62  ;;  %337 = vst [vmem:[%s1610_s6 + $0x1d8] sm:$0xff] %v336_v63  ;;  %v338_v0 = vld [vmem:[%s1605_s25 + $0x3c0] sm:$0xff]  ;;  %v340_v1 = vld [vmem:[%s1605_s25 + $0x3c8] sm:$0xff] }
  0x55   : > { %v342_v2 = vld [vmem:[%s1605_s25 + $0x3e0] sm:$0xff]  ;;  %339 = vst [vmem:[%s1610_s6 + $0x1e0] sm:$0xff] %v338_v0  ;;  %341 = vst [vmem:[%s1610_s6 + $0x1e8] sm:$0xff] %v340_v1  ;;  %v344_v3 = vld [vmem:[%s1605_s25 + $0x3e8] sm:$0xff] }
  0x56   : > { %343 = vst [vmem:[%s1610_s6 + $0x1f0] sm:$0xff] %v342_v2  ;;  %345 = vst [vmem:[%s1610_s6 + $0x1f8] sm:$0xff] %v344_v3 }
  0x57 PF: > { %p1106_p0 = scmp.ge.s32.totalorder %s1469_s22, 1  ;;  %p358_p1 = scmp.lt.s32.totalorder %s1469_s22, 5 }
  0x59   : > { %p359_p2 = pnand %p1106_p0, %p358_p1 }
  0x5a   : > { %s365_s0 = sand.u32 (!%p359_p2), 1, %s1445_s16   ;;  %s372_s5 = sand.u32 (!%p359_p2), 1, %s1437_s14  }
  0x5b   : > { %362 = sbr.rel (%p359_p2) target bundleno = 474 (0x1da), region = 70  ;;  %s1107_s23 = sshll.u32 (!%p359_p2), %s365_s0, 5 }
  0x5c   : > { %s1108_s28 = sshll.u32 (!%p359_p2), %s372_s5, 9  ;;  %s399_s7 = sand.u32 (!%p359_p2), 1, %s1429_s12  }
  0x5d   : > { %s1110_s11 = sshll.u32 (!%p359_p2), %s1457_s19, 1  ;;  %s1109_s25 = sshll.u32 (!%p359_p2), %s399_s7, 5 }
  0x5e   : > { %p407_p3 = scmp.lt.s32.totalorder (!%p359_p2), %s1110_s11, 3  ;;  %s1746_s27 = scalar_lea.vmem (!%p359_p2), [#allocation3], %s1107_s23 }
  0x5f   : > { %s1748_s6 = scalar_lea.vmem (!%p359_p2), [#allocation4], %s1108_s28  ;;  %s1750_s1 = scalar_lea.vmem (!%p359_p2), [#allocation5], %s1109_s25 }
  0x60   : > { %p1111_p4 = scmp.ne.s32.totalorder (!%p359_p2), %s1453_s18, 0 }
  0x62   : > { %s1900_s11 = smov (!%p407_p3, %s1110_s11), 3  ;;  %416 = sbr.rel (%p1111_p4) target bundleno = 109 (0x6d), region = 82 }
  0x63   : > { %s409_s4 = scalar_lea.vmem %s1871_s2, %s1900_s11  ;;  %v419_v4 = vlaneseq (!%p1111_p4) }
  0x64   : > { %v417_v6 = vld [vmem:[%s409_s4] sm:$0x3] (!%p1111_p4) }
  0x65   : > { %v420_v5 = vshrl.u32 (!%p1111_p4), %v419_v4, 7 }
  0x67   : > { %v421_v7 = vsub.s32 (!%p1111_p4), 0, %v420_v5  ;;  %v425_v8 = vsub.s32 (!%p1111_p4), 1, %v420_v5 }
  0x69   : > { %v422_v9 = vrot.slane %v417_v6, %v421_v7  ;;  %v426_v10 = vrot.slane %v417_v6, %v425_v8 }
  0x6b   : > { %429 = vst [vmem:[#allocation2] sm:$0xff] %v422_v9  ;;  %431 = vst [vmem:[#allocation2 + $0x10] sm:$0xff] %v422_v9 }
  0x6c   : > { %430 = vst [vmem:[#allocation2 + $0x8] sm:$0xff] %v426_v10  ;;  %432 = vst [vmem:[#allocation2 + $0x18] sm:$0xff] %v426_v10 }
  0x6d PF: > { %v1281_v11 = vld [vmem:[%s1748_s6 + $0x4] ss:$16 sps:$4 sm:$0xff]   ;;  %v1283_v12 = vld [vmem:[%s1748_s6 + $0xc] ss:$16 sps:$4 sm:$0xff]   ;;  %v1285_v13 = vld [vmem:[%s1748_s6] ss:$16 sps:$4 sm:$0xff]  }
  0x6e   : > { %845 = vmatprep.subr.bf16.mxu1 %v1281_v11  ;;  %v1286_v14 = vld [vmem:[%s1748_s6 + $0x8] ss:$16 sps:$4 sm:$0xff]   ;;  %888 = vmatprep.subr.bf16.mxu0 %v1283_v12  ;;  %v1287_v15 = vld [vmem:[%s1748_s6 + $0x24] ss:$16 sps:$4 sm:$0xff]   ;;  %v1289_v16 = vld [vmem:[%s1748_s6 + $0x2c] ss:$16 sps:$4 sm:$0xff]  }
  0x6f   : > { %846 = vmatpush1.bf16.xpose.msra.mxu1 %v1285_v13  ;;  %889 = vmatpush1.bf16.xpose.msra.mxu0 %v1286_v14  ;;  %v1291_v17 = vld [vmem:[%s1748_s6 + $0x20] ss:$16 sps:$4 sm:$0xff]   ;;  %v1292_v18 = vld [vmem:[%s1748_s6 + $0x28] ss:$16 sps:$4 sm:$0xff]   ;;  %v1293_v19 = vld [vmem:[%s1748_s6 + $0x44] ss:$16 sps:$4 sm:$0xff]  }
  0x70   : > { %847 = vmatprep.subr.bf16.mxu1 %v1287_v15  ;;  %890 = vmatprep.subr.bf16.mxu0 %v1289_v16  ;;  %v1295_v20 = vld [vmem:[%s1748_s6 + $0x4c] ss:$16 sps:$4 sm:$0xff]   ;;  %v1297_v21 = vld [vmem:[%s1748_s6 + $0x40] ss:$16 sps:$4 sm:$0xff]   ;;  %v1298_v22 = vld [vmem:[%s1748_s6 + $0x48] ss:$16 sps:$4 sm:$0xff]  }
  0x71   : > { %v1299_v23 = vld [vmem:[%s1748_s6 + $0x64] ss:$16 sps:$4 sm:$0xff]   ;;  %v1301_v24 = vld [vmem:[%s1748_s6 + $0x6c] ss:$16 sps:$4 sm:$0xff]   ;;  %v1303_v25 = vld [vmem:[%s1748_s6 + $0x60] ss:$16 sps:$4 sm:$0xff]  }
  0x72   : > { %v1304_v26 = vld [vmem:[%s1748_s6 + $0x68] ss:$16 sps:$4 sm:$0xff]   ;;  %v1305_v27 = vld [vmem:[%s1748_s6 + $0x84] ss:$16 sps:$4 sm:$0xff]   ;;  %v1307_v28 = vld [vmem:[%s1748_s6 + $0x8c] ss:$16 sps:$4 sm:$0xff]  }
  0x73   : > { %v1309_v29 = vld [vmem:[%s1748_s6 + $0x80] ss:$16 sps:$4 sm:$0xff]   ;;  %v1310_v30 = vld [vmem:[%s1748_s6 + $0x88] ss:$16 sps:$4 sm:$0xff]   ;;  %v1311_v31 = vld [vmem:[%s1748_s6 + $0xa4] ss:$16 sps:$4 sm:$0xff]  }
  0x74   : > { %v1313_v32 = vld [vmem:[%s1748_s6 + $0xac] ss:$16 sps:$4 sm:$0xff]   ;;  %v1315_v33 = vld [vmem:[%s1748_s6 + $0xa0] ss:$16 sps:$4 sm:$0xff]   ;;  %v1316_v34 = vld [vmem:[%s1748_s6 + $0xa8] ss:$16 sps:$4 sm:$0xff]  }
  0x75   : > { %v1317_v35 = vld [vmem:[%s1748_s6 + $0xc4] ss:$16 sps:$4 sm:$0xff]   ;;  %v1319_v36 = vld [vmem:[%s1748_s6 + $0xcc] ss:$16 sps:$4 sm:$0xff]   ;;  %v1321_v39 = vld [vmem:[%s1748_s6 + $0xc0] ss:$16 sps:$4 sm:$0xff]  }
  0x76   : > { %v1379_v37 = vld [vmem:[%s1746_s27 + $0x4] ss:$16 sps:$4 sm:$0xff]   ;;  %v1382_v38 = vld [vmem:[%s1746_s27 + $0xc] ss:$16 sps:$4 sm:$0xff]   ;;  %v1322_v40 = vld [vmem:[%s1748_s6 + $0xc8] ss:$16 sps:$4 sm:$0xff]  }
  0x77   : > { %848 = vmatpush1.bf16.xpose.msra.mxu1 %v1291_v17  ;;  %891 = vmatpush1.bf16.xpose.msra.mxu0 %v1292_v18  ;;  %v1323_v41 = vld [vmem:[%s1748_s6 + $0xe4] ss:$16 sps:$4 sm:$0xff]   ;;  %v1325_v42 = vld [vmem:[%s1748_s6 + $0xec] ss:$16 sps:$4 sm:$0xff]   ;;  %v1327_v43 = vld [vmem:[%s1748_s6 + $0xe0] ss:$16 sps:$4 sm:$0xff]  }
  0x78   : > { %849 = vmatprep.subr.bf16.mxu1 %v1293_v19  ;;  %892 = vmatprep.subr.bf16.mxu0 %v1295_v20  ;;  %v1328_v44 = vld [vmem:[%s1748_s6 + $0xe8] ss:$16 sps:$4 sm:$0xff]   ;;  %v1329_v45 = vld [vmem:[%s1748_s6 + $0x104] ss:$16 sps:$4 sm:$0xff]   ;;  %v1331_v46 = vld [vmem:[%s1748_s6 + $0x10c] ss:$16 sps:$4 sm:$0xff]  }
  0x79   : > { %877 = vmatprep.mubr.bf16.mxu1 %v1379_v37  ;;  %920 = vmatprep.mubr.bf16.mxu0 %v1382_v38  ;;  %v1333_v47 = vld [vmem:[%s1748_s6 + $0x100] ss:$16 sps:$4 sm:$0xff]   ;;  %v1334_v48 = vld [vmem:[%s1748_s6 + $0x108] ss:$16 sps:$4 sm:$0xff]   ;;  %v1335_v49 = vld [vmem:[%s1748_s6 + $0x124] ss:$16 sps:$4 sm:$0xff]  }
  0x7a   : > { %v1337_v50 = vld [vmem:[%s1748_s6 + $0x12c] ss:$16 sps:$4 sm:$0xff]   ;;  %v1339_v51 = vld [vmem:[%s1748_s6 + $0x120] ss:$16 sps:$4 sm:$0xff]   ;;  %v1340_v52 = vld [vmem:[%s1748_s6 + $0x128] ss:$16 sps:$4 sm:$0xff]  }
  0x7b   : > { %v1341_v53 = vld [vmem:[%s1748_s6 + $0x144] ss:$16 sps:$4 sm:$0xff]   ;;  %v1343_v54 = vld [vmem:[%s1748_s6 + $0x14c] ss:$16 sps:$4 sm:$0xff]   ;;  %v1345_v55 = vld [vmem:[%s1748_s6 + $0x140] ss:$16 sps:$4 sm:$0xff]  }
  0x7c   : > { %v1346_v56 = vld [vmem:[%s1748_s6 + $0x148] ss:$16 sps:$4 sm:$0xff]   ;;  %v1347_v57 = vld [vmem:[%s1748_s6 + $0x164] ss:$16 sps:$4 sm:$0xff]   ;;  %v1349_v58 = vld [vmem:[%s1748_s6 + $0x16c] ss:$16 sps:$4 sm:$0xff]  }
  0x7d   : > { %v1351_v59 = vld [vmem:[%s1748_s6 + $0x160] ss:$16 sps:$4 sm:$0xff]   ;;  %v1352_v60 = vld [vmem:[%s1748_s6 + $0x168] ss:$16 sps:$4 sm:$0xff]   ;;  %v1353_v61 = vld [vmem:[%s1748_s6 + $0x184] ss:$16 sps:$4 sm:$0xff]  }
  0x7e   : > { %v1355_v62 = vld [vmem:[%s1748_s6 + $0x18c] ss:$16 sps:$4 sm:$0xff]   ;;  %v1357_v63 = vld [vmem:[%s1748_s6 + $0x180] ss:$16 sps:$4 sm:$0xff]   ;;  %v1358_v0 = vld [vmem:[%s1748_s6 + $0x188] ss:$16 sps:$4 sm:$0xff]  }
  0x7f   : > { %850 = vmatpush1.bf16.xpose.msra.mxu1 %v1297_v21  ;;  %893 = vmatpush1.bf16.xpose.msra.mxu0 %v1298_v22  ;;  %v1359_v1 = vld [vmem:[%s1748_s6 + $0x1a4] ss:$16 sps:$4 sm:$0xff]   ;;  %v1361_v2 = vld [vmem:[%s1748_s6 + $0x1ac] ss:$16 sps:$4 sm:$0xff]   ;;  %v1363_v3 = vld [vmem:[%s1748_s6 + $0x1a0] ss:$16 sps:$4 sm:$0xff]  }
  0x80   : > { %851 = vmatprep.subr.bf16.mxu1 %v1299_v23  ;;  %894 = vmatprep.subr.bf16.mxu0 %v1301_v24  ;;  %v1364_v4 = vld [vmem:[%s1748_s6 + $0x1a8] ss:$16 sps:$4 sm:$0xff]   ;;  %v1365_v5 = vld [vmem:[%s1748_s6 + $0x1c4] ss:$16 sps:$4 sm:$0xff]   ;;  %v1367_v6 = vld [vmem:[%s1748_s6 + $0x1cc] ss:$16 sps:$4 sm:$0xff]  }
  0x81   : > { %v1369_v7 = vld [vmem:[%s1748_s6 + $0x1c0] ss:$16 sps:$4 sm:$0xff]   ;;  %v1370_v8 = vld [vmem:[%s1748_s6 + $0x1c8] ss:$16 sps:$4 sm:$0xff]   ;;  %v1371_v9 = vld [vmem:[%s1748_s6 + $0x1e4] ss:$16 sps:$4 sm:$0xff]  }
  0x82   : > { %v1373_v10 = vld [vmem:[%s1748_s6 + $0x1ec] ss:$16 sps:$4 sm:$0xff]   ;;  %v1375_v11 = vld [vmem:[%s1748_s6 + $0x1e0] ss:$16 sps:$4 sm:$0xff]   ;;  %v1376_v12 = vld [vmem:[%s1748_s6 + $0x1e8] ss:$16 sps:$4 sm:$0xff]  }
  0x83   : > { %v1377_v13 = vld [vmem:[%s1746_s27] ss:$16 sps:$4 sm:$0xff]   ;;  %v1380_v14 = vld [vmem:[%s1746_s27 + $0x8] ss:$16 sps:$4 sm:$0xff]   ;;  %p1180_p5 = scmp.ne.s32.totalorder %s1453_s18, 1 }
  0x84   : > { %v433_v16 = vld [vmem:[#allocation2] sm:$0xff]  ;;  %v434_v20 = vld [vmem:[#allocation2 + $0x8] sm:$0xff]  ;;  %v435_v24 = vld [vmem:[#allocation2 + $0x10] sm:$0xff] }
  0x87   : > { %852 = vmatpush1.bf16.xpose.msra.mxu1 %v1303_v25  ;;  %895 = vmatpush1.bf16.xpose.msra.mxu0 %v1304_v26 }
  0x88   : > { %853 = vmatprep.subr.bf16.mxu1 %v1305_v27  ;;  %896 = vmatprep.subr.bf16.mxu0 %v1307_v28 }
  0x8f   : > { %854 = vmatpush1.bf16.xpose.msra.mxu1 %v1309_v29  ;;  %897 = vmatpush1.bf16.xpose.msra.mxu0 %v1310_v30  ;;  %v436_v29 = vld [vmem:[#allocation2 + $0x18] sm:$0xff] }
  0x90   : > { %855 = vmatprep.subr.bf16.mxu1 %v1311_v31  ;;  %898 = vmatprep.subr.bf16.mxu0 %v1313_v32 }
  0x97   : > { %856 = vmatpush1.bf16.xpose.msra.mxu1 %v1315_v33  ;;  %899 = vmatpush1.bf16.xpose.msra.mxu0 %v1316_v34 }
  0x98   : > { %857 = vmatprep.subr.bf16.mxu1 %v1317_v35  ;;  %900 = vmatprep.subr.bf16.mxu0 %v1319_v36 }
  0x9f   : > { %858 = vmatpush1.bf16.xpose.msra.mxu1 %v1321_v39  ;;  %901 = vmatpush1.bf16.xpose.msra.mxu0 %v1322_v40 }
  0xa0   : > { %859 = vmatprep.subr.bf16.mxu1 %v1323_v41  ;;  %902 = vmatprep.subr.bf16.mxu0 %v1325_v42 }
  0xa7   : > { %860 = vmatpush1.bf16.xpose.msra.mxu1 %v1327_v43  ;;  %903 = vmatpush1.bf16.xpose.msra.mxu0 %v1328_v44 }
  0xa8   : > { %861 = vmatprep.subr.bf16.mxu1 %v1329_v45  ;;  %904 = vmatprep.subr.bf16.mxu0 %v1331_v46 }
  0xaf   : > { %862 = vmatpush1.bf16.xpose.msra.mxu1 %v1333_v47  ;;  %905 = vmatpush1.bf16.xpose.msra.mxu0 %v1334_v48 }
  0xb0   : > { %863 = vmatprep.subr.bf16.mxu1 %v1335_v49  ;;  %906 = vmatprep.subr.bf16.mxu0 %v1337_v50 }
  0xb7   : > { %864 = vmatpush1.bf16.xpose.msra.mxu1 %v1339_v51  ;;  %907 = vmatpush1.bf16.xpose.msra.mxu0 %v1340_v52 }
  0xb8   : > { %865 = vmatprep.subr.bf16.mxu1 %v1341_v53  ;;  %908 = vmatprep.subr.bf16.mxu0 %v1343_v54 }
  0xbf   : > { %866 = vmatpush1.bf16.xpose.msra.mxu1 %v1345_v55  ;;  %909 = vmatpush1.bf16.xpose.msra.mxu0 %v1346_v56 }
  0xc0   : > { %867 = vmatprep.subr.bf16.mxu1 %v1347_v57  ;;  %910 = vmatprep.subr.bf16.mxu0 %v1349_v58 }
  0xc7   : > { %868 = vmatpush1.bf16.xpose.msra.mxu1 %v1351_v59  ;;  %911 = vmatpush1.bf16.xpose.msra.mxu0 %v1352_v60 }
  0xc8   : > { %869 = vmatprep.subr.bf16.mxu1 %v1353_v61  ;;  %912 = vmatprep.subr.bf16.mxu0 %v1355_v62 }
  0xcf   : > { %870 = vmatpush1.bf16.xpose.msra.mxu1 %v1357_v63  ;;  %913 = vmatpush1.bf16.xpose.msra.mxu0 %v1358_v0 }
  0xd0   : > { %871 = vmatprep.subr.bf16.mxu1 %v1359_v1  ;;  %914 = vmatprep.subr.bf16.mxu0 %v1361_v2 }
  0xd7   : > { %872 = vmatpush1.bf16.xpose.msra.mxu1 %v1363_v3  ;;  %915 = vmatpush1.bf16.xpose.msra.mxu0 %v1364_v4 }
  0xd8   : > { %873 = vmatprep.subr.bf16.mxu1 %v1365_v5  ;;  %916 = vmatprep.subr.bf16.mxu0 %v1367_v6 }
  0xdf   : > { %874 = vmatpush1.bf16.xpose.msra.mxu1 %v1369_v7  ;;  %917 = vmatpush1.bf16.xpose.msra.mxu0 %v1370_v8 }
  0xe0   : > { %875 = vmatprep.subr.bf16.mxu1 %v1371_v9  ;;  %918 = vmatprep.subr.bf16.mxu0 %v1373_v10 }
  0xe7   : > { %876 = vmatpush1.bf16.xpose.msra.mxu1 %v1375_v11  ;;  %919 = vmatpush1.bf16.xpose.msra.mxu0 %v1376_v12 }
  0xee   : > { %878 = vmatmul.mubr.bf16.vlgmr.msra.gmra.mrb[0].mxu1 %v1377_v13  ;;  %921 = vmatmul.mubr.bf16.vlgmr.msra.gmra.mrb[0].mxu0 %v1380_v14 }
 0x1c1   : > { %v879_v15 = vpop.f32.mrb[0].mxu1  ;;  %v922_v17 = vpop.f32.mrb[0].mxu0 }
 0x1c2   : > { %v923_v18 = vadd.f32 %v922_v17, %v879_v15  ;;  %v881_v19 = vpop.f32.mrb[1].mxu1  ;;  %v924_v21 = vpop.f32.mrb[1].mxu0 }
 0x1c3   : > { %v925_v22 = vadd.f32 %v924_v21, %v881_v19  ;;  %v883_v23 = vpop.f32.mrb[2].mxu1  ;;  %v926_v25 = vpop.f32.mrb[2].mxu0  ;;  %942 = sbr.rel (%p1180_p5) target bundleno = 466 (0x1d2), region = 86 }
 0x1c4   : > { %v931_v26 = vadd.f32 %v923_v18, %v433_v16  ;;  %v927_v27 = vadd.f32 %v926_v25, %v883_v23  ;;  %v885_v28 = vpop.f32.mrb[3].mxu1  ;;  %v928_v30 = vpop.f32.mrb[3].mxu0 }
 0x1c5   : > { %v932_v31 = vadd.f32 %v925_v22, %v434_v20  ;;  %v929_v32 = vadd.f32 %v928_v30, %v885_v28 }
 0x1c6   : > { %935 = vst [vmem:[#allocation2] sm:$0xff] %v931_v26  ;;  %v933_v33 = vadd.f32 %v927_v27, %v435_v24 }
 0x1c7   : > { %936 = vst [vmem:[#allocation2 + $0x8] sm:$0xff] %v932_v31  ;;  %v934_v34 = vadd.f32 %v929_v32, %v436_v29 }
 0x1c8   : > { %937 = vst [vmem:[#allocation2 + $0x10] sm:$0xff] %v933_v33 }
 0x1c9   : > { %938 = vst [vmem:[#allocation2 + $0x18] sm:$0xff] %v934_v34 }
 0x1cd   : > { %v943_v35 = vld [vmem:[#allocation2] sm:$0xff] }
 0x1ce   : > { %v944_v36 = vld [vmem:[#allocation2 + $0x8] sm:$0xff]  ;;  %947 = vst [vmem:[%s1750_s1] sm:$0xff] %v943_v35 }
 0x1cf   : > { %v945_v37 = vld [vmem:[#allocation2 + $0x10] sm:$0xff]  ;;  %948 = vst [vmem:[%s1750_s1 + $0x8] sm:$0xff] %v944_v36 }
 0x1d0   : > { %949 = vst [vmem:[%s1750_s1 + $0x10] sm:$0xff] %v945_v37  ;;  %v946_v38 = vld [vmem:[#allocation2 + $0x18] sm:$0xff] }
 0x1d1   : > { %950 = vst [vmem:[%s1750_s1 + $0x18] sm:$0xff] %v946_v38 }
 0x1d2 PF: > { %957 = sbr.rel (!%p1585_p12) target bundleno = 474 (0x1da), region = 90  ;;  %s1188_s12 = sshll.u32 (%p1585_p12), %s1457_s19, 4 }
 0x1d3   : > { %s963_s18 = scalar_lea.vmem (%p1585_p12), %s1872_s3, %s1188_s12 }
 0x1d5   : > { %v976_v39 = vld [vmem:[%s1750_s1] sm:$0xff] (%p1585_p12) }
 0x1d6   : > { %v978_v40 = vld [vmem:[%s1750_s1 + $0x8] sm:$0xff] (%p1585_p12)  ;;  %977 = vst [vmem:[%s963_s18] sm:$0xff] (%p1585_p12), %v976_v39 }
 0x1d7   : > { %v980_v41 = vld [vmem:[%s1750_s1 + $0x10] sm:$0xff] (%p1585_p12)  ;;  %979 = vst [vmem:[%s963_s18 + $0x8] sm:$0xff] (%p1585_p12), %v978_v40 }
 0x1d8   : > { %v982_v42 = vld [vmem:[%s1750_s1 + $0x18] sm:$0xff] (%p1585_p12)  ;;  %981 = vst [vmem:[%s963_s18 + $0x20] sm:$0xff] (%p1585_p12), %v980_v41 }
 0x1d9   : > { %983 = vst [vmem:[%s963_s18 + $0x28] sm:$0xff] %v982_v42 }
 0x1da PF: > { %s13_s22 = sadd.s32 1, %s1469_s22   ;;  %s1882_s10 = sld [smem:[#allocation6_spill]] }
 0x1db   : > { %p10_p6 = scmp.ge.s32.totalorder %s13_s22, 6   ;;  %s1883_s12 = smov %s1433_s13 }
 0x1dc   : > { %s1884_s13 = smov %s1583_s9  ;;  %s1885_s14 = smov %s1441_s15 }
 0x1dd   : > { %s1886_s15 = smov %s1580_s8  ;;  %s1887_s16 = smov %s1449_s17 }
 0x1de   : > { %s1888_s17 = smov %s1566_s30  ;;  %s1889_s18 = smov %s1461_s20 }
 0x1df   : > { %s1890_s19 = smov %s1465_s21  ;;  %s1891_s20 = smov %s1894_s24 }
 0x1e0   : > { %s1892_s21 = smov %s1882_s10  ;;  %12 = sbr.rel (!%p10_p6) target bundleno = 9 (0x9), region = 155 }

</bundles_post_ra>
